<compile_context>
chip_gen: v7x
topology: tpu7x:2x2x1
jax: 0.10.0
libtpu: 0.0.40
codegen_flags: <defaults>
</compile_context>

<pallas_src>
import functools

import jax
import jax.numpy as jnp
from jax import lax
from jax.experimental import pallas as pl
from jax.experimental.pallas import tpu as pltpu


def _round_up(x, m):
    return ((x + m - 1) // m) * m


def _round_down(x, m):
    return (x // m) * m


# Keep the double-buffered VMEM footprint comfortably under v5e's 16 MiB scoped default
# (also leaves plenty of headroom on v7x's 64 MiB physical VMEM).
_VMEM_BUDGET = 12 * 1024 * 1024


# ----------------------------------------------------------------------------- kernels
def _smear_rows_kernel(dist_ref, out_ref, *, coeff, start, delta):
    # dist_ref: (tile_n, 1) f32, out_ref: (tile_n, G).  mu varies only along lanes, so
    # build it at (1, G) and let the subtract broadcast across sublanes.
    g = lax.broadcasted_iota(jnp.int32, (1, out_ref.shape[1]), 1).astype(jnp.float32)
    mu = start + delta * g                        # (1, G)
    d = dist_ref[...] - mu                        # (tile_n, G)
    out_ref[...] = jnp.exp(coeff * d * d).astype(out_ref.dtype)


def _smear_cols_kernel(dist_ref, out_ref, *, coeff, start, delta):
    # dist_ref: (1, tile_n) f32, out_ref: (G, tile_n) -- lane-dense, unmasked stores.
    g = lax.broadcasted_iota(jnp.int32, (out_ref.shape[0], 1), 0).astype(jnp.float32)
    mu = start + delta * g                        # (G, 1)
    d = dist_ref[...] - mu                        # (G, tile_n)
    out_ref[...] = jnp.exp(coeff * d * d).astype(out_ref.dtype)


# ----------------------------------------------------------------------------- wrapper
def gaussian_smearing(dist, *, start=0.0, stop=5.0, num_gaussians=50,
                      tile_n=8192, transposed_output=False, out_dtype=jnp.float32):
    """Gaussian smearing of distances.

    dist: arbitrary-shaped float array (N = dist.size values).
    Returns (N, num_gaussians) in `out_dtype` (matching the PyTorch module), or
    (num_gaussians, N) when transposed_output=True (lane-dense stores; cheapest layout
    on every TPU generation -- prefer it when the consumer can take (G, N)).
    """
    if num_gaussians < 2:
        raise ValueError("num_gaussians must be >= 2 (delta = (stop-start)/(G-1)).")

    delta = (stop - start) / (num_gaussians - 1)
    coeff = -0.5 / (delta ** 2)                   # python floats, baked into the kernel

    d_flat = dist.reshape(-1).astype(jnp.float32)
    n = d_flat.shape[0]

    out_itemsize = jnp.dtype(out_dtype).itemsize
    sub_mult = max(8, 8 * (4 // out_itemsize))    # sublane multiple: 8 (f32) / 16 (bf16)

    # Accurate per-tile VMEM accounting (VMEM pads the last dim to 128 lanes and the
    # second-last dim to the sublane multiple), double-buffered by the pipeline.
    if transposed_output:
        in_per = 8 * 4                                             # (1, tile_n) block
        out_per = _round_up(num_gaussians, sub_mult) * out_itemsize  # (G, tile_n) block
        align = 128                                                # tile_n sits on lanes
    else:
        in_per = 128 * 4                                           # (tile_n, 1) block
        out_per = _round_up(num_gaussians, 128) * out_itemsize     # (tile_n, G) block
        align = sub_mult                                           # tile_n sits on sublanes

    max_tile = max(align, _round_down(_VMEM_BUDGET // (2 * (in_per + out_per)), align))
    tile_n = max(align, _round_up(tile_n, align))
    tile_n = min(tile_n, max_tile)
    tile_n = min(tile_n, _round_up(n, align))     # don't blow the block far past tiny n
    if n >= 2048:
        # Guarantee >= 2 grid steps so v7x's two TensorCores both get work.
        tile_n = min(tile_n, _round_up(-(-n // 2), align))
    tile_n = max(align, tile_n)

    grid = (pl.cdiv(n, tile_n),)                  # ragged last block masked by Pallas
    params = pltpu.CompilerParams(dimension_semantics=("parallel",))
    kern_kw = dict(coeff=coeff, start=start, delta=delta)

    if transposed_output:
        d2 = d_flat.reshape(1, n)
        return pl.pallas_call(
            functools.partial(_smear_cols_kernel, **kern_kw),
            out_shape=jax.ShapeDtypeStruct((num_gaussians, n), out_dtype),
            grid_spec=pl.GridSpec(
                grid=grid,
                in_specs=[pl.BlockSpec((1, tile_n), lambda i: (0, i))],
                out_specs=pl.BlockSpec((num_gaussians, tile_n), lambda i: (0, i)),
            ),
            compiler_params=params,
        )(d2)

    # Default (N, G) layout (PyTorch semantics): last block dim == num_gaussians exactly.
    d2 = d_flat.reshape(n, 1)
    return pl.pallas_call(
        functools.partial(_smear_rows_kernel, **kern_kw),
        out_shape=jax.ShapeDtypeStruct((n, num_gaussians), out_dtype),
        grid_spec=pl.GridSpec(
            grid=grid,
            in_specs=[pl.BlockSpec((tile_n, 1), lambda i: (i, 0))],
            out_specs=pl.BlockSpec((tile_n, num_gaussians), lambda i: (i, 0)),
        ),
        compiler_params=params,
    )(d2)


# ----------------------------------------------------------------------------- reference
def gaussian_smearing_ref(dist, *, start=0.0, stop=5.0, num_gaussians=50):
    mu = jnp.linspace(start, stop, num_gaussians, dtype=jnp.float32)
    delta = (stop - start) / (num_gaussians - 1)
    coeff = -0.5 / (delta ** 2)
    d = dist.reshape(-1, 1).astype(jnp.float32) - mu.reshape(1, -1)
    return jnp.exp(coeff * d * d)


if __name__ == "__main__":
    key = jax.random.PRNGKey(0)
    k0, k1 = jax.random.split(key)

    # Small "distance" tensor (e.g. edge distances in a graph): 2 x 64 = 128 values.
    dist = jax.random.uniform(k0, (2, 64), dtype=jnp.float32, minval=0.0, maxval=5.0)
    ref = gaussian_smearing_ref(dist)

    # Default layout: matches the PyTorch module exactly -> (N, G) float32.
    out = jax.block_until_ready(gaussian_smearing(dist))
    assert out.shape == (dist.size, 50), out.shape
    assert jnp.allclose(out, ref, atol=1e-4, rtol=1e-4), float(jnp.max(jnp.abs(out - ref)))

    # Transposed lane-dense layout (G, N) -- cheapest layout on all generations.
    out_t = jax.block_until_ready(gaussian_smearing(dist, transposed_output=True))
    assert out_t.shape == (50, dist.size), out_t.shape
    assert jnp.allclose(out_t, ref.T, atol=1e-4, rtol=1e-4), \
        float(jnp.max(jnp.abs(out_t - ref.T)))

    # Ragged N (3 x 37 = 111, not a multiple of the tile) + bf16 output knob.
    dist2 = jax.random.uniform(k1, (3, 37), dtype=jnp.float32, minval=0.0, maxval=5.0)
    ref2 = gaussian_smearing_ref(dist2)
    out2 = jax.block_until_ready(gaussian_smearing(dist2, out_dtype=jnp.bfloat16))
    assert out2.shape == (dist2.size, 50), out2.shape
    assert out2.dtype == jnp.bfloat16
    assert jnp.allclose(out2.astype(jnp.float32), ref2, atol=2e-2, rtol=2e-2), \
        float(jnp.max(jnp.abs(out2.astype(jnp.float32) - ref2)))

    print("KERNEL_OK")
</pallas_src>

<mosaic_0001>
module attributes {stable_mosaic.version = 11 : i64} {
  func.func @_smear_rows_kernel(%arg0: i32, %arg1: memref<128x1xf32, #tpu.memory_space<vmem>>, %arg2: memref<128x50xf32, #tpu.memory_space<vmem>>) attributes {dimension_semantics = [#tpu.dimension_semantics<parallel>], iteration_bounds = array<i64: 1>, scalar_prefetch = 0 : i64, scratch_operands = 0 : i64, tpu.core_type = #tpu.core_type<tc>, window_params = [{transform_indices = @transform_0, window_bounds = array<i64: 128, 1>}, {transform_indices = @transform_1, window_bounds = array<i64: 128, 50>}]} {
    %0 = tpu.iota {dimensions = array<i32: 1>} : vector<1x50xi32>
    %1 = arith.sitofp %0 : vector<1x50xi32> to vector<1x50xf32>
    %cst = arith.constant 0.10204082 : f32
    %2 = vector.broadcast %cst : f32 to vector<1x50xf32>
    %3 = arith.mulf %2, %1 : vector<1x50xf32>
    %cst_0 = arith.constant 0.000000e+00 : f32
    %4 = vector.broadcast %cst_0 : f32 to vector<1x50xf32>
    %5 = arith.addf %4, %3 : vector<1x50xf32>
    %c0 = arith.constant 0 : index
    %c0_1 = arith.constant 0 : index
    %6 = vector.load %arg1[%c0, %c0_1] : memref<128x1xf32, #tpu.memory_space<vmem>>, vector<128x1xf32>
    %7 = vector.broadcast %6 : vector<128x1xf32> to vector<128x50xf32>
    %8 = vector.broadcast %5 : vector<1x50xf32> to vector<128x50xf32>
    %9 = arith.subf %7, %8 : vector<128x50xf32>
    %cst_2 = arith.constant -4.802000e+01 : f32
    %10 = vector.broadcast %cst_2 : f32 to vector<128x50xf32>
    %11 = arith.mulf %10, %9 : vector<128x50xf32>
    %12 = arith.mulf %11, %9 : vector<128x50xf32>
    %13 = math.exp %12 : vector<128x50xf32>
    %c0_3 = arith.constant 0 : index
    %c0_4 = arith.constant 0 : index
    %14 = vector.load %arg2[%c0_3, %c0_4] : memref<128x50xf32, #tpu.memory_space<vmem>>, vector<128x50xf32>
    tpu.vector_store %arg2[%c0_3, %c0_4], %13 {strides = array<i32>} : memref<128x50xf32, #tpu.memory_space<vmem>>, vector<128x50xf32>,
    return
  }
  func.func @transform_0(%arg0: i32) -> (i32, i32) {
    %c0_i32 = arith.constant 0 : i32
    %c0_i32_0 = arith.constant 0 : i32
    return %arg0, %c0_i32 : i32, i32
  }
  func.func @transform_1(%arg0: i32) -> (i32, i32) {
    %c0_i32 = arith.constant 0 : i32
    %c0_i32_0 = arith.constant 0 : i32
    return %arg0, %c0_i32 : i32, i32
  }
}

</mosaic_0001>

<bundles_post_ra>
// kernel: tpu_custom_call.1
= control target key start
LH: loop header
LB: loop body
LE: loop exit
PB: predicated region body
PF: predicated region fallthrough
CT: control target
= control target key end

     0   :  { %v245_v0 = vmov 0   ;;  %v8_v17 = vlaneseq  ;;  %vm189_vm0 = vcmask 408576   ;;  %s386_s0 = inlined_call_operand.vmem [shape: f32[128,1], index: 0, kind: input, shape index: {}]   ;;  %s387_s1 = inlined_call_operand.vmem [shape: f32[128,50], index: 1, kind: output, shape index: {}]  }
   0x1   :  { %212 = vset.pattern.permute.xlu1 %v245_v0  ;;  %211 = vset.pattern.permute.xlu0 %v245_v0  ;;  %v15_v1 = vld [vmem:[%s386_s0 + $0x10] sm:$0xff]  ;;  %v13_v2 = vld [vmem:[%s386_s0] sm:$0xff]  ;;  %v16_v3 = vld [vmem:[%s386_s0 + $0x18] sm:$0xff] }
   0x2   :  { %41 = vperm.xlu1 %212, %v15_v1   ;;  %31 = vperm.xlu0 %211, %v13_v2   ;;  %v14_v4 = vld [vmem:[%s386_s0 + $0x8] sm:$0xff]  ;;  %v17_v6 = vld [vmem:[%s386_s0 + $0x20] sm:$0xff]  ;;  %v20_v7 = vld [vmem:[%s386_s0 + $0x38] sm:$0xff]  ;;  %v9_v18 = vand.u32 127, %v8_v17 }
   0x3   :  { %v18_v5 = vld [vmem:[%s386_s0 + $0x28] sm:$0xff]  ;;  %v19_v8 = vld [vmem:[%s386_s0 + $0x30] sm:$0xff]  ;;  %v21_v10 = vld [vmem:[%s386_s0 + $0x40] sm:$0xff] }
   0x4   :  { %v22_v9 = vld [vmem:[%s386_s0 + $0x48] sm:$0xff]  ;;  %v24_v11 = vld [vmem:[%s386_s0 + $0x58] sm:$0xff]  ;;  %v23_v12 = vld [vmem:[%s386_s0 + $0x50] sm:$0xff]  ;;  %v10_v19 = vcvt.s32.f32 %v9_v18 }
   0x5   :  { %v26_v13 = vld [vmem:[%s386_s0 + $0x68] sm:$0xff]  ;;  %v25_v14 = vld [vmem:[%s386_s0 + $0x60] sm:$0xff]  ;;  %v28_v15 = vld [vmem:[%s386_s0 + $0x78] sm:$0xff] }
   0x6   :  { %46 = vperm.xlu1 %212, %v16_v3   ;;  %36 = vperm.xlu0 %211, %v14_v4   ;;  %v27_v16 = vld [vmem:[%s386_s0 + $0x70] sm:$0xff]  ;;  %v304_v20 = vmul.f32 0.10204082, %v10_v19 }
   0xa   :  { %56 = vperm.xlu1 %212, %v18_v5   ;;  %51 = vperm.xlu0 %211, %v17_v6  }
   0xe   :  { %66 = vperm.xlu1 %212, %v20_v7   ;;  %61 = vperm.xlu0 %211, %v19_v8  }
  0x12   :  { %76 = vperm.xlu1 %212, %v22_v9   ;;  %71 = vperm.xlu0 %211, %v21_v10  }
  0x16   :  { %86 = vperm.xlu1 %212, %v24_v11   ;;  %81 = vperm.xlu0 %211, %v23_v12  }
  0x1a   :  { %96 = vperm.xlu1 %212, %v26_v13   ;;  %91 = vperm.xlu0 %211, %v25_v14  }
  0x1e   :  { %106 = vperm.xlu1 %212, %v28_v15   ;;  %101 = vperm.xlu0 %211, %v27_v16  }
  0x81   :  { %v42_v21 = vpop.permute.xlu1 %41  ;;  %v32_v22 = vpop.permute.xlu0 %31 }
  0x82   :  { %v111_v23 = vsub.f32 %v42_v21, %v304_v20  ;;  %v109_v24 = vsub.f32 %v32_v22, %v304_v20 }
  0x84   :  { %v127_v25 = vmul.f32 -48.02, %v111_v23  ;;  %v125_v26 = vmul.f32 -48.02, %v109_v24 }
  0x85   :  { %v47_v27 = vpop.permute.xlu1 %46  ;;  %v37_v28 = vpop.permute.xlu0 %36 }
  0x86   :  { %v143_v29 = vmul.f32 %v127_v25, %v111_v23  ;;  %v141_v30 = vmul.f32 %v125_v26, %v109_v24  ;;  %v112_v31 = vsub.f32 %v47_v27, %v304_v20  ;;  %v110_v32 = vsub.f32 %v37_v28, %v304_v20 }
  0x88   :  { %v161_v33 = vmul.f32 1.442695, %v143_v29  ;;  %v157_v34 = vmul.f32 1.442695, %v141_v30  ;;  %v128_v35 = vmul.f32 -48.02, %v112_v31 }
  0x89   :  { %v126_v36 = vmul.f32 -48.02, %v110_v32  ;;  %v57_v37 = vpop.permute.xlu1 %56  ;;  %v52_v38 = vpop.permute.xlu0 %51 }
  0x8a   :  { %213 = vpow2.f32 %v161_v33  ;;  %v144_v39 = vmul.f32 %v128_v35, %v112_v31  ;;  %v114_v40 = vsub.f32 %v57_v37, %v304_v20  ;;  %v113_v41 = vsub.f32 %v52_v38, %v304_v20 }
  0x8b   :  { %215 = vpow2.f32 %v157_v34  ;;  %v142_v42 = vmul.f32 %v126_v36, %v110_v32 }
  0x8c   :  { %v163_v43 = vmul.f32 1.442695, %v144_v39  ;;  %v130_v44 = vmul.f32 -48.02, %v114_v40  ;;  %v129_v45 = vmul.f32 -48.02, %v113_v41 }
  0x8d   :  { %v159_v46 = vmul.f32 1.442695, %v142_v42  ;;  %v67_v47 = vpop.permute.xlu1 %66  ;;  %v62_v48 = vpop.permute.xlu0 %61 }
  0x8e   :  { %217 = vpow2.f32 %v163_v43  ;;  %v146_v49 = vmul.f32 %v130_v44, %v114_v40  ;;  %v145_v50 = vmul.f32 %v129_v45, %v113_v41  ;;  %v116_v51 = vsub.f32 %v67_v47, %v304_v20 }
  0x8f   :  { %219 = vpow2.f32 %v159_v46  ;;  %v115_v52 = vsub.f32 %v62_v48, %v304_v20 }
  0x90   :  { %v167_v53 = vmul.f32 1.442695, %v146_v49  ;;  %v165_v54 = vmul.f32 1.442695, %v145_v50  ;;  %v132_v55 = vmul.f32 -48.02, %v116_v51 }
  0x91   :  { %v131_v56 = vmul.f32 -48.02, %v115_v52  ;;  %v77_v57 = vpop.permute.xlu1 %76  ;;  %v72_v58 = vpop.permute.xlu0 %71 }
  0x92   :  { %221 = vpow2.f32 %v167_v53  ;;  %v148_v59 = vmul.f32 %v132_v55, %v116_v51  ;;  %v118_v60 = vsub.f32 %v77_v57, %v304_v20  ;;  %v117_v61 = vsub.f32 %v72_v58, %v304_v20 }
  0x93   :  { %223 = vpow2.f32 %v165_v54  ;;  %v147_v62 = vmul.f32 %v131_v56, %v115_v52 }
  0x94   :  { %v214_v63 = vpop.eup %213  ;;  %v171_v0 = vmul.f32 1.442695, %v148_v59  ;;  %v134_v1 = vmul.f32 -48.02, %v118_v60  ;;  %v133_v2 = vmul.f32 -48.02, %v117_v61 }
  0x95   :  { %v216_v3 = vpop.eup %215  ;;  %192 = vst.msk [vmem:[%s387_s1 + $0x10] sm:$0xff] %vm189_vm0, %v214_v63  ;;  %v169_v4 = vmul.f32 1.442695, %v147_v62  ;;  %v87_v5 = vpop.permute.xlu1 %86 }
  0x96   :  { %v82_v6 = vpop.permute.xlu0 %81  ;;  %190 = vst.msk [vmem:[%s387_s1] sm:$0xff] %vm189_vm0, %v216_v3  ;;  %225 = vpow2.f32 %v171_v0  ;;  %v150_v7 = vmul.f32 %v134_v1, %v118_v60  ;;  %v149_v8 = vmul.f32 %v133_v2, %v117_v61  ;;  %v120_v9 = vsub.f32 %v87_v5, %v304_v20 }
  0x97   :  { %227 = vpow2.f32 %v169_v4  ;;  %v119_v10 = vsub.f32 %v82_v6, %v304_v20 }
  0x98   :  { %v218_v11 = vpop.eup %217  ;;  %v175_v12 = vmul.f32 1.442695, %v150_v7  ;;  %v173_v13 = vmul.f32 1.442695, %v149_v8  ;;  %v136_v14 = vmul.f32 -48.02, %v120_v9 }
  0x99   :  { %v220_v15 = vpop.eup %219  ;;  %193 = vst.msk [vmem:[%s387_s1 + $0x18] sm:$0xff] %vm189_vm0, %v218_v11  ;;  %v135_v16 = vmul.f32 -48.02, %v119_v10  ;;  %v97_v17 = vpop.permute.xlu1 %96 }
  0x9a   :  { %v92_v18 = vpop.permute.xlu0 %91  ;;  %191 = vst.msk [vmem:[%s387_s1 + $0x8] sm:$0xff] %vm189_vm0, %v220_v15  ;;  %229 = vpow2.f32 %v175_v12  ;;  %v152_v19 = vmul.f32 %v136_v14, %v120_v9  ;;  %v122_v21 = vsub.f32 %v97_v17, %v304_v20 }
  0x9b   :  { %v121_v22 = vsub.f32 %v92_v18, %v304_v20  ;;  %231 = vpow2.f32 %v173_v13  ;;  %v151_v23 = vmul.f32 %v135_v16, %v119_v10 }
  0x9c   :  { %v222_v24 = vpop.eup %221  ;;  %v179_v25 = vmul.f32 1.442695, %v152_v19  ;;  %v138_v26 = vmul.f32 -48.02, %v122_v21 }
  0x9d   :  { %v137_v27 = vmul.f32 -48.02, %v121_v22  ;;  %v224_v28 = vpop.eup %223  ;;  %195 = vst.msk [vmem:[%s387_s1 + $0x28] sm:$0xff] %vm189_vm0, %v222_v24  ;;  %v177_v29 = vmul.f32 1.442695, %v151_v23  ;;  %v107_v30 = vpop.permute.xlu1 %106 }
  0x9e   :  { %v102_v31 = vpop.permute.xlu0 %101  ;;  %194 = vst.msk [vmem:[%s387_s1 + $0x20] sm:$0xff] %vm189_vm0, %v224_v28  ;;  %233 = vpow2.f32 %v179_v25  ;;  %v154_v32 = vmul.f32 %v138_v26, %v122_v21  ;;  %v124_v34 = vsub.f32 %v107_v30, %v304_v20 }
  0x9f   :  { %v153_v33 = vmul.f32 %v137_v27, %v121_v22  ;;  %235 = vpow2.f32 %v177_v29  ;;  %v123_v35 = vsub.f32 %v102_v31, %v304_v20 }
  0xa0   :  { %v226_v36 = vpop.eup %225  ;;  %v183_v37 = vmul.f32 1.442695, %v154_v32  ;;  %v140_v39 = vmul.f32 -48.02, %v124_v34 }
  0xa1   :  { %v181_v38 = vmul.f32 1.442695, %v153_v33  ;;  %v228_v40 = vpop.eup %227  ;;  %197 = vst.msk [vmem:[%s387_s1 + $0x38] sm:$0xff] %vm189_vm0, %v226_v36  ;;  %v139_v41 = vmul.f32 -48.02, %v123_v35 }
  0xa2   :  { %196 = vst.msk [vmem:[%s387_s1 + $0x30] sm:$0xff] %vm189_vm0, %v228_v40  ;;  %237 = vpow2.f32 %v183_v37  ;;  %v156_v42 = vmul.f32 %v140_v39, %v124_v34 }
  0xa3   :  { %239 = vpow2.f32 %v181_v38  ;;  %v155_v20 = vmul.f32 %v139_v41, %v123_v35 }
  0xa4   :  { %v230_v43 = vpop.eup %229  ;;  %v187_v44 = vmul.f32 1.442695, %v156_v42 }
  0xa5   :  { %v232_v45 = vpop.eup %231  ;;  %199 = vst.msk [vmem:[%s387_s1 + $0x48] sm:$0xff] %vm189_vm0, %v230_v43  ;;  %v185_v46 = vmul.f32 1.442695, %v155_v20 }
  0xa6   :  { %198 = vst.msk [vmem:[%s387_s1 + $0x40] sm:$0xff] %vm189_vm0, %v232_v45  ;;  %241 = vpow2.f32 %v187_v44 }
  0xa7   :  { %243 = vpow2.f32 %v185_v46 }
  0xa8   :  { %v234_v47 = vpop.eup %233 }
  0xa9   :  { %v236_v48 = vpop.eup %235  ;;  %201 = vst.msk [vmem:[%s387_s1 + $0x58] sm:$0xff] %vm189_vm0, %v234_v47 }
  0xaa   :  { %200 = vst.msk [vmem:[%s387_s1 + $0x50] sm:$0xff] %vm189_vm0, %v236_v48 }
  0xac   :  { %v238_v49 = vpop.eup %237 }
  0xad   :  { %v240_v50 = vpop.eup %239  ;;  %203 = vst.msk [vmem:[%s387_s1 + $0x68] sm:$0xff] %vm189_vm0, %v238_v49 }
  0xae   :  { %202 = vst.msk [vmem:[%s387_s1 + $0x60] sm:$0xff] %vm189_vm0, %v240_v50 }
  0xb0   :  { %v242_v51 = vpop.eup %241 }
  0xb1   :  { %v244_v52 = vpop.eup %243  ;;  %205 = vst.msk [vmem:[%s387_s1 + $0x78] sm:$0xff] %vm189_vm0, %v242_v51 }
  0xb2   :  { %204 = vst.msk [vmem:[%s387_s1 + $0x70] sm:$0xff] %vm189_vm0, %v244_v52 }

</bundles_post_ra>
